<compile_context>
chip_gen: v7x
topology: tpu7x:2x2x1
jax: 0.10.0
libtpu: 0.0.40
codegen_flags: <defaults>
</compile_context>

<pallas_src>
import numpy as np

import jax
import jax.numpy as jnp
from jax.experimental import pallas as pl
from jax.experimental.pallas import tpu as pltpu

SLOWFAST_ALPHA = 4


def _temporal_gather_kernel(idx_ref, x_ref, o_ref):
    # idx_ref (scalar-prefetch, SMEM) is consumed by the index_maps; the body
    # is a pure copy of the selected (C, 1, S0, S1) slab into output slot t.
    del idx_ref
    o_ref[...] = x_ref[...]


def _slow_pathway_indices(T: int, n_slow: int) -> jnp.ndarray:
    """Exact-integer equivalent of torch.linspace(0, T-1, n_slow).long()."""
    if n_slow == 1:
        return jnp.zeros((1,), dtype=jnp.int32)
    i = jnp.arange(n_slow, dtype=jnp.int32)
    return (i * (T - 1)) // (n_slow - 1)


def pack_pathway(frames):
    """Returns [slow_pathway, fast_pathway] for frames of shape (C, T, H, W)."""
    C, T, H, W = frames.shape
    n_slow = T // SLOWFAST_ALPHA
    fast = frames  # identity -- no kernel needed

    if n_slow == 0:
        # T < SLOWFAST_ALPHA: torch.linspace(..., 0) is empty -> empty gather.
        return [jnp.zeros((C, 0, H, W), frames.dtype), fast]

    slow_idx = _slow_pathway_indices(T, n_slow)

    # Lane/sublane-dense layout for the copy: the H*W plane is contiguous, so
    # re-splitting it as (8, H*W // 8) is a free reshape and makes every block
    # an integral number of (8, 128) tiles (when H*W % 1024 == 0, e.g. 224x224).
    hw = H * W
    if hw % 8 == 0:
        s0, s1 = 8, hw // 8
    else:
        s0, s1 = H, W
    x = frames.reshape(C, T, s0, s1)

    # NOTE: for tiny clips (like the test input) plain jnp.take is already at
    # roofline; the kernel is kept unconditional here so it is exercised.
    slow = pl.pallas_call(
        _temporal_gather_kernel,
        out_shape=jax.ShapeDtypeStruct((C, n_slow, s0, s1), frames.dtype),
        grid_spec=pltpu.PrefetchScalarGridSpec(
            num_scalar_prefetch=1,
            grid=(n_slow,),
            in_specs=[
                # One full-channel slab at the prefetched temporal index.
                pl.BlockSpec((C, 1, s0, s1),
                             lambda t, idx_ref: (0, idx_ref[t], 0, 0)),
            ],
            out_specs=pl.BlockSpec((C, 1, s0, s1),
                                   lambda t, idx_ref: (0, t, 0, 0)),
        ),
        compiler_params=pltpu.CompilerParams(
            dimension_semantics=("parallel",)),
    )(slow_idx, x)

    return [slow.reshape(C, n_slow, H, W), fast]


if __name__ == "__main__":
    key = jax.random.PRNGKey(0)
    # Small shapes: C=4 channels, T=16 frames, 16x16 spatial.
    frames = jax.random.normal(key, (4, 16, 16, 16), dtype=jnp.float32)

    slow_pathway, fast_pathway = pack_pathway(frames)
    jax.block_until_ready(slow_pathway)
    jax.block_until_ready(fast_pathway)

    # Correctness check against the PyTorch semantics
    # (torch.linspace(0, T-1, T//alpha).long() index_select along dim 1).
    C, T, H, W = frames.shape
    n_slow = T // SLOWFAST_ALPHA
    ref_idx = np.linspace(0.0, float(T - 1), n_slow).astype(np.int64)
    ref_slow = jnp.take(frames, jnp.asarray(ref_idx), axis=1)

    assert slow_pathway.shape == (C, n_slow, H, W)
    assert fast_pathway.shape == frames.shape
    assert jnp.array_equal(slow_pathway, ref_slow)
    assert jnp.array_equal(fast_pathway, frames)

    print("KERNEL_OK")
</pallas_src>

<mosaic_0001>
module attributes {stable_mosaic.version = 11 : i64} {
  func.func @_temporal_gather_kernel(%arg0: i32, %arg1: memref<4xi32, #tpu.memory_space<smem>>, %arg2: memref<4x1x8x32xf32, #tpu.memory_space<vmem>>, %arg3: memref<4x1x8x32xf32, #tpu.memory_space<vmem>>) attributes {dimension_semantics = [#tpu.dimension_semantics<parallel>], iteration_bounds = array<i64: 4>, scalar_prefetch = 1 : i64, scratch_operands = 0 : i64, tpu.core_type = #tpu.core_type<tc>, window_params = [{transform_indices = @transform_0, window_bounds = array<i64: 4, 1, 8, 32>}, {transform_indices = @transform_1, window_bounds = array<i64: 4, 1, 8, 32>}]} {
    %c0 = arith.constant 0 : index
    %c0_0 = arith.constant 0 : index
    %c0_1 = arith.constant 0 : index
    %c0_2 = arith.constant 0 : index
    %0 = vector.load %arg2[%c0, %c0_0, %c0_1, %c0_2] : memref<4x1x8x32xf32, #tpu.memory_space<vmem>>, vector<4x1x8x32xf32>
    %c0_3 = arith.constant 0 : index
    %c0_4 = arith.constant 0 : index
    %c0_5 = arith.constant 0 : index
    %c0_6 = arith.constant 0 : index
    %1 = vector.load %arg3[%c0_3, %c0_4, %c0_5, %c0_6] : memref<4x1x8x32xf32, #tpu.memory_space<vmem>>, vector<4x1x8x32xf32>
    tpu.vector_store %arg3[%c0_3, %c0_4, %c0_5, %c0_6], %0 {strides = array<i32>} : memref<4x1x8x32xf32, #tpu.memory_space<vmem>>, vector<4x1x8x32xf32>,
    return
  }
  func.func @transform_0(%arg0: i32, %arg1: memref<4xi32, #tpu.memory_space<smem>>) -> (i32, i32, i32, i32) {
    %0 = arith.index_cast %arg0 : i32 to index
    %1 = memref.load %arg1[%0] : memref<4xi32, #tpu.memory_space<smem>>
    %c0_i32 = arith.constant 0 : i32
    %c0_i32_0 = arith.constant 0 : i32
    %c0_i32_1 = arith.constant 0 : i32
    %c0_i32_2 = arith.constant 0 : i32
    return %c0_i32, %1, %c0_i32_0, %c0_i32_1 : i32, i32, i32, i32
  }
  func.func @transform_1(%arg0: i32, %arg1: memref<4xi32, #tpu.memory_space<smem>>) -> (i32, i32, i32, i32) {
    %c0_i32 = arith.constant 0 : i32
    %c0_i32_0 = arith.constant 0 : i32
    %c0_i32_1 = arith.constant 0 : i32
    %c0_i32_2 = arith.constant 0 : i32
    return %c0_i32, %arg0, %c0_i32_0, %c0_i32_1 : i32, i32, i32, i32
  }
}

</mosaic_0001>

<bundles_post_ra>
// kernel: tpu_custom_call.1
= control target key start
LH: loop header
LB: loop body
LE: loop exit
PB: predicated region body
PF: predicated region fallthrough
CT: control target
= control target key end

     0   :  { %s699_s0 = inlined_call_operand.hbm [shape: s32[4], index: 0, kind: input, shape index: {}]   ;;  %s700_s1 = inlined_call_operand.hbm [shape: f32[4,16,8,32], index: 1, kind: input, shape index: {}]   ;;  %s701_s2 = inlined_call_operand.hbm [shape: f32[4,4,8,32], index: 2, kind: output, shape index: {}]  }
   0x1   :  { %s331_s11 = scalar_lea.hbm %s699_s0, 16 }
   0x2   :  { %p332_p0 = scmp.ne.s32.totalorder %s699_s0, %s331_s11  ;;  %p335_p1 = scmp.lt.u32.totalorder %s331_s11, %s699_s0 }
   0x4   :  { %p337_p2 = pnand %p335_p1, %p332_p0 }
   0x6   :  { %340 = shalt.err (!%p337_p2)  }
   0x7   :  { %s465_s16 = smov [#allocation3]  }
   0x8   :  { %8 = dma.hbm_to_smem %s699_s0, 16, %s465_s16, [#allocation2] }
   0x9   :  { %427 = dma.done.wait [#allocation2], 16 }
   0xa   :  { %428 = vsyncadd [#allocation2], 4294967280 }
   0xb   :  { %10 = sfence }
   0xc   :  { %11 = vsyncpa [#allocation5], 0 }
   0xd   :  { %13 = vsyncpa [#allocation5 + $0x1], 0 }
   0xe   :  { %14 = vsyncpa [#allocation6], 0 }
   0xf   :  { %16 = vsyncpa [#allocation6 + $0x1], 0  ;;  %s501_s19 = smov 0   ;;  %s503_s20 = smov 0  }
  0x10   :  { %s505_s21 = smov 0   ;;  %s507_s22 = smov 0  }
  0x11   :  { %s509_s23 = smov 0   ;;  %s511_s24 = smov 0  }
  0x12   :  { %s513_s0 = smov 0  }
  0x13 LB: > { %s535_s25 = sadd.s32 4294967295, %s463_s0   ;;  %s238_s26 = sadd.s32 4294967294, %s463_s0   ;;  %s463_s0 = sphi %s513_s0, %s719_s0   ;;  %s459_s24 = sphi %s511_s24, %s718_s24   ;;  %s455_s23 = sphi %s509_s23, %s717_s23   ;;  %s451_s22 = sphi %s507_s22, %s716_s22   ;;  %s447_s21 = sphi %s505_s21, %s715_s21   ;;  %s443_s20 = sphi %s503_s20, %s714_s20   ;;  %s439_s19 = sphi %s501_s19, %s713_s19  }
  0x14   : > { %s539_s27 = sadd.s32 1, %s463_s0   ;;  %s26_s28 = sld [smem:[#allocation3 + %s463_s0]] }
  0x15   : > { %s27_s29 = sld [smem:[#allocation3 + %s539_s27]]  ;;  %s31_s30 = sadd.s32 1, %s459_s24 }
  0x16   : > { %p38_p3 = scmp.ne.s32.totalorder %s459_s24, %s455_s23  ;;  %p39_p4 = scmp.eq.s32.totalorder %s463_s0, 0 }
  0x17   : > { %p44_p5 = scmp.ne.s32.totalorder %s455_s23, %s451_s22  ;;  %p45_p6 = scmp.eq.s32.totalorder %s535_s25, 0 }
  0x18   : > { %p549_p7 = por %p39_p4, %p38_p3  ;;  %s54_s4 = ssub.s32 %s463_s0, %s539_s27 }
  0x19   : > { %p555_p8 = por %p45_p6, %p44_p5  ;;  %p55_p9 = scmp.eq.s32.totalorder %s54_s4, 0 }
  0x1a   : > { %s57_s6 = sadd.s32 1, %s447_s21  ;;  %p67_p10 = scmp.ne.s32.totalorder %s447_s21, %s443_s20 }
  0x1b   : > { %s705_s5 = scalar_select %p555_p8, 1, 0 }
  0x1c   : > { %s28_s7 = ssub.s32 %s26_s28, %s27_s29  ;;  %p68_p11 = scmp.eq.s32.totalorder %s535_s25, 3 }
  0x1d   : > { %p29_p12 = scmp.eq.s32.totalorder %s28_s7, 0  ;;  %p73_p13 = scmp.ne.s32.totalorder %s443_s20, %s439_s19 }
  0x1e   : > { %s566_s8 = scalar_select %p55_p9, %s447_s21, %s57_s6  }
  0x1f   : > { %s569_s9 = scalar_select %p29_p12, %s459_s24, %s31_s30  }
  0x20   : > { %p571_p0 = por %p68_p11, %p67_p10  ;;  %p74_p1 = scmp.eq.s32.totalorder %s238_s26, 3 }
  0x21   : > { %p266_p2 = scmp.lt.s32.totalorder %s463_s0, 4  ;;  %s94_s12 = sand.u32 1, %s459_s24  }
  0x22   : > { %s706_s10 = scalar_select %p571_p0, 1, 0 }
  0x23   : > { %p576_p3 = por %p74_p1, %p73_p13  ;;  %s241_s13 = sshll.u32 %s94_s12, 5 }
  0x24   : > { %p583_p4 = pnand %p266_p2, %p549_p7  ;;  %s98_s18 = scalar_lea.vmem [#allocation4], %s241_s13 }
  0x25   : > { %s707_s11 = scalar_select %p576_p3, 1, 0 }
  0x26   : > { %s250_s15 = scalar_select %p549_p7, [#allocation3], [#allocation8] }
  0x27   : > { %s251_s16 = scalar_select %p549_p7, %s463_s0, 0 }
  0x28   : > { %s721_s15 = smov (!%p266_p2, %s250_s15), [#allocation9]  ;;  %s105_s22 = sshll.u32 %s98_s18, 4  ;;  %s593_s22 = int_to_ptr.vmem [resolvable:$true] %s105_s22 }
  0x29   : > { %s723_s16 = smov (!%p266_p2, %s251_s16), 0  ;;  %p243_p5 = scmp.ge.s32.totalorder %s463_s0, 1 }
  0x2a   : > { %s99_s17 = sld [smem:[%s721_s15 + %s723_s16]]  ;;  %p113_p6 = scmp.lt.s32.totalorder %s463_s0, 5 }
  0x2b   : > { %s605_s4 = scalar_lea.sflag [#allocation5], %s94_s12  ;;  %p343_p10 = pneg %p583_p4 }
  0x2c   : > { %p596_p9 = pnand %p243_p5, %p113_p6  ;;  %s346_s15 = scalar_lea.hbm %s700_s1, 8192 }
  0x30   : > { %s242_s28 = sshll.u32 %s99_s17, 7 }
  0x31   : > { %s603_s3 = scalar_lea.hbm %s700_s1, %s242_s28 }
  0x32   : > { %s341_s6 = scalar_lea.hbm %s603_s3, 512  ;;  %p347_p13 = scmp.lt.u32.totalorder %s603_s3, %s700_s1 }
  0x33   : > { %p342_p7 = scmp.ne.s32.totalorder %s603_s3, %s341_s6  ;;  %p348_p1 = scmp.lt.u32.totalorder %s346_s15, %s341_s6 }
  0x34   : > { %p350_p5 = scmp.lt.u32.totalorder %s341_s6, %s603_s3 }
  0x35   : > { %p344_p11 = pnand %p343_p10, %p342_p7  ;;  %p349_p2 = por %p348_p1, %p347_p13 }
  0x37   : > { %p345_p12 = pneg %p344_p11  ;;  %p351_p6 = por %p350_p5, %p349_p2 }
  0x39   : > { %p352_p3 = pnand %p351_p6, %p345_p12 }
  0x3b   : > { %355 = shalt.err (!%p352_p3)
}
  0x3c   : > { %s356_s12 = scalar_lea.vmem %s593_s22, 512  ;;  %s466_s18 = smov [#allocation4]  }
  0x3d   : > { %p357_p7 = scmp.ne.s32.totalorder %s593_s22, %s356_s12  ;;  %s361_s28 = sshll.u32 %s466_s18, 4  ;;  %s362_s28 = int_to_ptr.vmem [resolvable:$false] %s361_s28 }
  0x3e   : > { %s363_s29 = scalar_lea.vmem %s362_s28, 1024  ;;  %p364_p8 = scmp.lt.s32.totalorder %s593_s22, %s362_s28 }
  0x3f   : > { %p359_p11 = pnand %p357_p7, %p343_p10  ;;  %p365_p13 = scmp.lt.s32.totalorder %s363_s29, %s356_s12 }
  0x41   : > { %p360_p0 = pneg %p359_p11  ;;  %p366_p1 = por %p365_p13, %p364_p8 }
  0x43   : > { %p367_p2 = pnand %p366_p1, %p360_p0 }
  0x45   : > { %370 = shalt.err (!%p367_p2)
}
  0x46   : > { %s467_s30 = smov 2048   ;;  %s468_s6 = smov 128  }
  0x47   : > { %s469_s7 = smov 8   ;;  %117 = sbr.rel (%p596_p9) target bundleno = 107 (0x6b), region = 24 }
  0x48   : > { %261 = dma.hbm_to_vmem [thread:$0]  (!%p583_p4), %s603_s3, 512, %s593_s22, %s605_s4, %s467_s30, %s468_s6, %s469_s7  }
  0x49   : > { %s119_s13 = sand.u32 (!%p596_p9), 1, %s455_s23   ;;  %p710_p8 = scmp.ne.s32.totalorder (!%p596_p9), %s705_s5, 0 }
  0x4a   : > { %s244_s15 = sshll.u32 (!%p596_p9), %s119_s13, 5  ;;  %s120_s16 = scalar_lea.sflag (!%p596_p9), [#allocation5], %s119_s13 }
  0x4b   : > { %s123_s17 = scalar_lea.vmem (!%p596_p9), [#allocation4], %s244_s15 }
  0x4e   : > { %430 = dma.done.wait (%p710_p8), %s120_s16, 512  }
  0x4f   : > { %432 = vsyncadd (%p710_p8), %s120_s16, 4294966784  ;;  %s139_s12 = sand.u32 1, %s443_s20   ;;  %s247_s14 = sshll.u32 %s535_s25, 7  ;;  %vm147_vm0 = vcmask 261120   ;;  %v143_v0 = vld [vmem:[%s123_s17] sm:$0xff]  ;;  %v144_v1 = vld [vmem:[%s123_s17 + $0x8] sm:$0xff] }
  0x50   : > { %s245_s18 = sshll.u32 %s139_s12, 5  ;;  %s645_s28 = scalar_lea.hbm %s701_s2, %s247_s14  ;;  %v145_v2 = vld [vmem:[%s123_s17 + $0x10] sm:$0xff]  ;;  %v146_v3 = vld [vmem:[%s123_s17 + $0x18] sm:$0xff] }
  0x51   : > { %s141_s22 = scalar_lea.vmem [#allocation7], %s245_s18  ;;  %s649_s25 = scalar_lea.sflag [#allocation6], %s139_s12 }
  0x52   : > { %s165_s26 = sshll.u32 %s141_s22, 4  ;;  %148 = vst.msk [vmem:[%s141_s22] sm:$0xff] %vm147_vm0, %v143_v0  ;;  %149 = vst.msk [vmem:[%s141_s22 + $0x8] sm:$0xff] %vm147_vm0, %v144_v1  ;;  %p711_p3 = scmp.ne.s32.totalorder %s706_s10, 0  ;;  %s647_s26 = int_to_ptr.vmem [resolvable:$true] %s165_s26 }
  0x53   : > { %150 = vst.msk [vmem:[%s141_s22 + $0x10] sm:$0xff] %vm147_vm0, %v145_v2  ;;  %151 = vst.msk [vmem:[%s141_s22 + $0x18] sm:$0xff] %vm147_vm0, %v146_v3  ;;  %s371_s5 = scalar_lea.vmem %s647_s26, 512  ;;  %s470_s29 = smov [#allocation7]  }
  0x54   : > { %p372_p0 = scmp.ne.s32.totalorder %s647_s26, %s371_s5  ;;  %s375_s30 = sshll.u32 %s470_s29, 4  ;;  %s376_s30 = int_to_ptr.vmem [resolvable:$false] %s375_s30 }
  0x55   : > { %s377_s6 = scalar_lea.vmem %s376_s30, 1024  ;;  %p378_p10 = scmp.lt.s32.totalorder %s647_s26, %s376_s30 }
  0x56   : > { %p373_p4 = pnand %p372_p0, %p711_p3  ;;  %p379_p12 = scmp.lt.s32.totalorder %s377_s6, %s371_s5 }
  0x58   : > { %p374_p9 = pneg %p373_p4  ;;  %p380_p5 = por %p379_p12, %p378_p10 }
  0x5a   : > { %p381_p6 = pnand %p380_p5, %p374_p9 }
  0x5c   : > { %384 = shalt.err (!%p381_p6)
}
  0x5d   : > { %s385_s7 = scalar_lea.hbm %s645_s28, 512  ;;  %s389_s16 = scalar_lea.hbm %s701_s2, 2048 }
  0x5e   : > { %p386_p7 = scmp.ne.s32.totalorder %s645_s28, %s385_s7  ;;  %p390_p1 = scmp.lt.u32.totalorder %s645_s28, %s701_s2 }
  0x5f   : > { %p391_p2 = scmp.lt.u32.totalorder %s389_s16, %s385_s7  ;;  %p393_p0 = scmp.lt.u32.totalorder %s385_s7, %s645_s28 }
  0x60   : > { %p387_p11 = pnand %p386_p7, %p711_p3 }
  0x61   : > { %p392_p8 = por %p391_p2, %p390_p1 }
  0x62   : > { %p388_p13 = pneg %p387_p11 }
  0x63   : > { %p394_p4 = por %p393_p0, %p392_p8 }
  0x65   : > { %p395_p9 = pnand %p394_p4, %p388_p13 }
  0x67   : > { %398 = shalt.err (!%p395_p9)
}
  0x68   : > { %s471_s18 = smov 128   ;;  %s472_s14 = smov 512  }
  0x69   : > { %s473_s22 = smov 8  }
  0x6a   : > { %254 = dma.vmem_to_hbm [thread:$0]  (%p711_p3), %s647_s26, 512, %s645_s28, %s649_s25, %s471_s18, %s472_s14, %s473_s22  }
  0x6b PF: > { %p267_p10 = scmp.ge.s32.totalorder %s463_s0, 2  ;;  %s180_s3 = sand.u32 1, %s439_s19  }
  0x6c   : > { %p712_p12 = scmp.ne.s32.totalorder %s707_s11, 0  ;;  %s181_s4 = scalar_lea.sflag [#allocation6], %s180_s3 }
  0x6e   : > { %p263_p5 = pnand %p267_p10, %p712_p12 }
  0x70   : > { %434 = dma.done.wait (!%p263_p5), %s181_s4, 512  }
  0x71   : > { %436 = vsyncadd (!%p263_p5), %s181_s4, 4294966784  ;;  %p19_p3 = scmp.ge.s32.totalorder %s539_s27, 6   ;;  %s713_s19 = smov %s443_s20 }
  0x72   : > { %s714_s20 = smov %s447_s21  ;;  %s715_s21 = smov %s566_s8 }
  0x73   : > { %s716_s22 = smov %s455_s23  ;;  %s717_s23 = smov %s459_s24 }
  0x74   : > { %s718_s24 = smov %s569_s9  ;;  %s719_s0 = smov %s539_s27 }
  0x75   :  { %21 = sbr.rel (!%p19_p3) target bundleno = 19 (0x13), region = 69 }
  0x7c   :  { %186 = vsyncpa [#allocation5], 1 }
  0x7d   :  { %188 = vsyncpa [#allocation5 + $0x1], 1 }
  0x7e   :  { %189 = vsyncpa [#allocation6], 1 }
  0x7f   :  { %191 = vsyncpa [#allocation6 + $0x1], 1 }

</bundles_post_ra>
